<compile_context>
chip_gen: v7x
topology: tpu7x:2x2x1
jax: 0.10.0
libtpu: 0.0.40
codegen_flags: <defaults>
</compile_context>

<pallas_src>
import functools
import math

import jax
import jax.numpy as jnp
from jax.experimental import pallas as pl
from jax.experimental.pallas import tpu as pltpu

LANES = 128
_LOG2 = math.log(2.0)


def _bce_logits_partial_kernel(target_ref, x_ref, o_ref, acc_ref, *,
                               n_rows, rows_per_tile, steps_per_slice):
    """Accumulates the sum of per-element BCE-with-logits losses.

    Grid = (parallel slices, sequential tiles per slice). Each slice writes its
    raw partial sum (broadcast over an (8,128) slab) to its own output block;
    the wrapper combines partials, applies pad correction, mean and weight.
    """
    p = pl.program_id(0)          # parallel slice (megacore axis on v7x)
    i = pl.program_id(1)          # sequential tile index within the slice

    @pl.when(i == 0)
    def _():
        acc_ref[...] = jnp.zeros_like(acc_ref)

    t = target_ref[0]             # real/fake label value (SMEM scalar)
    x = x_ref[...].astype(jnp.float32)

    # Numerically stable BCE-with-logits (same form PyTorch uses):
    #   max(x, 0) - x*t + log1p(exp(-|x|))
    per_elem = jnp.maximum(x, 0.0) - x * t + jnp.log1p(jnp.exp(-jnp.abs(x)))

    tile = p * steps_per_slice + i                 # global tile index
    n_tiles = pl.cdiv(n_rows, rows_per_tile)
    ragged = (n_rows % rows_per_tile) != 0         # compile-time Python bool

    if ragged:
        is_last_tile = tile == (n_tiles - 1)

        @pl.when(jnp.logical_not(is_last_tile))
        def _():
            acc_ref[...] += per_elem

        @pl.when(is_last_tile)
        def _():
            # Only the ragged last tile pays for masking (its tail rows are
            # an out-of-bounds partial block and may contain garbage).
            row = (jax.lax.broadcasted_iota(jnp.int32, per_elem.shape, 0)
                   + tile * rows_per_tile)
            acc_ref[...] += jnp.where(row < n_rows, per_elem, 0.0)
    else:
        acc_ref[...] += per_elem

    @pl.when(i == pl.num_programs(1) - 1)
    def _():
        total = jnp.sum(acc_ref[...])              # one XLU reduce per slice
        o_ref[...] = jnp.full(o_ref.shape, total, dtype=jnp.float32)


def gan_loss(x, target_is_real, is_disc=False, *,
             real_label_val=1.0, fake_label_val=0.0, loss_weight=1.0,
             rows_per_tile=1024):
    """Pallas equivalent of GanLoss.forward(input, target_is_real, is_disc)."""
    assert rows_per_tile % 8 == 0 and rows_per_tile >= 8

    n = int(x.size)
    x_flat = jnp.ravel(x)                          # keep dtype; cast in-kernel

    n_rows = pl.cdiv(n, LANES)
    col_pad = n_rows * LANES - n
    if col_pad:
        # BCE-with-logits at x == 0 is exactly log(2) regardless of the label,
        # so zero padding is corrected by a compile-time constant at the end.
        x_flat = jnp.pad(x_flat, (0, col_pad))
    x2d = x_flat.reshape(n_rows, LANES)

    # Tile: as large as possible up to rows_per_tile (512 KiB f32 default).
    rpt = rows_per_tile if n_rows > rows_per_tile else n_rows
    n_tiles = pl.cdiv(n_rows, rpt)
    # Expose a parallel axis for the 2nd TensorCore (v7x) when tiles split evenly.
    n_parallel = 2 if (n_tiles >= 2 and n_tiles % 2 == 0) else 1
    steps = n_tiles // n_parallel

    target = float(real_label_val if target_is_real else fake_label_val)
    target_smem = jnp.array([target], dtype=jnp.float32)

    kernel = functools.partial(
        _bce_logits_partial_kernel,
        n_rows=n_rows, rows_per_tile=rpt, steps_per_slice=steps)

    out = pl.pallas_call(
        kernel,
        out_shape=jax.ShapeDtypeStruct((n_parallel, 8, LANES), jnp.float32),
        grid_spec=pltpu.PrefetchScalarGridSpec(
            num_scalar_prefetch=1,
            grid=(n_parallel, steps),
            in_specs=[pl.BlockSpec((rpt, LANES),
                                   lambda p, i, tgt: (p * steps + i, 0))],
            out_specs=pl.BlockSpec((1, 8, LANES),
                                   lambda p, i, tgt: (p, 0, 0)),
            scratch_shapes=[pltpu.VMEM((rpt, LANES), jnp.float32)],
        ),
        compiler_params=pltpu.CompilerParams(
            dimension_semantics=("parallel", "arbitrary")),
    )(target_smem, x2d)

    total = jnp.sum(out[:, 0, 0])
    if col_pad:
        total = total - jnp.float32(col_pad * _LOG2)
    loss = total / jnp.float32(n)
    return loss if is_disc else loss * loss_weight


def _reference_gan_loss(x, target_is_real, is_disc=False, *,
                        real_label_val=1.0, fake_label_val=0.0,
                        loss_weight=1.0):
    t = real_label_val if target_is_real else fake_label_val
    x = x.astype(jnp.float32)
    per = jnp.maximum(x, 0.0) - x * t + jnp.log1p(jnp.exp(-jnp.abs(x)))
    loss = jnp.mean(per)
    return loss if is_disc else loss * loss_weight


if __name__ == "__main__":
    key = jax.random.PRNGKey(0)
    k1, k2, k3 = jax.random.split(key, 3)

    ok = True

    # Case 1: small NCHW discriminator logits (n divisible by 128, single tile).
    x_small = jax.random.normal(k1, (2, 4, 16, 16), dtype=jnp.float32)
    # Case 2: n not divisible by 128 (exercises column padding + correction).
    x_odd = jax.random.normal(k2, (3, 5, 7, 11), dtype=jnp.float32)
    # Case 3: multi-tile, both-slice (parallel) grid with a ragged last tile.
    x_big = jax.random.normal(k3, (4, 8, 40, 40), dtype=jnp.float32)

    cases = [
        (x_small, {}),
        (x_odd, {}),
        (x_big, {"rows_per_tile": 104}),
    ]

    for xv, kwargs in cases:
        for target_is_real in (True, False):
            for is_disc in (False, True):
                got = gan_loss(xv, target_is_real, is_disc,
                               loss_weight=0.5, **kwargs)
                got = jax.block_until_ready(got)
                want = _reference_gan_loss(xv, target_is_real, is_disc,
                                           loss_weight=0.5)
                want = jax.block_until_ready(want)
                if not jnp.allclose(got, want, rtol=1e-4, atol=1e-6):
                    ok = False

    if ok:
        print("KERNEL_OK")
    else:
        print("KERNEL_MISMATCH")
</pallas_src>

<mosaic_0001>
module attributes {stable_mosaic.version = 11 : i64} {
  func.func @_bce_logits_partial_kernel(%arg0: i32, %arg1: i32, %arg2: memref<1xf32, #tpu.memory_space<smem>>, %arg3: memref<16x128xf32, #tpu.memory_space<vmem>>, %arg4: memref<1x8x128xf32, #tpu.memory_space<vmem>>, %arg5: memref<16x128xf32, #tpu.memory_space<vmem>>) attributes {dimension_semantics = [#tpu.dimension_semantics<parallel>, #tpu.dimension_semantics<arbitrary>], iteration_bounds = array<i64: 1, 1>, scalar_prefetch = 1 : i64, scratch_operands = 1 : i64, tpu.core_type = #tpu.core_type<tc>, window_params = [{transform_indices = @transform_0, window_bounds = array<i64: 16, 128>}, {transform_indices = @transform_1, window_bounds = array<i64: 1, 8, 128>}]} {
    %c0_i32 = arith.constant 0 : i32
    %0 = arith.cmpi eq, %arg1, %c0_i32 : i32
    %1 = arith.extui %0 : i1 to i32
    %c0_i32_0 = arith.constant 0 : i32
    %2 = arith.cmpi ne, %1, %c0_i32_0 : i32
    scf.if %2 {
      %cst_10 = arith.constant 0.000000e+00 : f32
      %22 = vector.broadcast %cst_10 : f32 to vector<16x128xf32>
      %c0_11 = arith.constant 0 : index
      %c0_12 = arith.constant 0 : index
      %23 = vector.load %arg5[%c0_11, %c0_12] : memref<16x128xf32, #tpu.memory_space<vmem>>, vector<16x128xf32>
      tpu.vector_store %arg5[%c0_11, %c0_12], %22 {strides = array<i32>} : memref<16x128xf32, #tpu.memory_space<vmem>>, vector<16x128xf32>,
    } else {
    }
    %c0 = arith.constant 0 : index
    %3 = memref.load %arg2[%c0] : memref<1xf32, #tpu.memory_space<smem>>
    %c0_1 = arith.constant 0 : index
    %c0_2 = arith.constant 0 : index
    %4 = vector.load %arg3[%c0_1, %c0_2] : memref<16x128xf32, #tpu.memory_space<vmem>>, vector<16x128xf32>
    %cst = arith.constant 0.000000e+00 : f32
    %5 = vector.broadcast %cst : f32 to vector<16x128xf32>
    %6 = arith.maximumf %4, %5 : vector<16x128xf32>
    %7 = vector.broadcast %3 : f32 to vector<16x128xf32>
    %8 = arith.mulf %4, %7 : vector<16x128xf32>
    %9 = arith.subf %6, %8 : vector<16x128xf32>
    %10 = math.absf %4 : vector<16x128xf32>
    %cst_3 = arith.constant 0.000000e+00 : f32
    %11 = vector.broadcast %cst_3 : f32 to vector<16x128xf32>
    %12 = arith.subf %11, %10 : vector<16x128xf32>
    %13 = math.exp %12 : vector<16x128xf32>
    %14 = math.log1p %13 : vector<16x128xf32>
    %15 = arith.addf %9, %14 : vector<16x128xf32>
    %c0_4 = arith.constant 0 : index
    %c0_5 = arith.constant 0 : index
    %16 = vector.load %arg5[%c0_4, %c0_5] : memref<16x128xf32, #tpu.memory_space<vmem>>, vector<16x128xf32>
    %17 = arith.addf %16, %15 : vector<16x128xf32>
    %c0_6 = arith.constant 0 : index
    %c0_7 = arith.constant 0 : index
    %18 = vector.load %arg5[%c0_6, %c0_7] : memref<16x128xf32, #tpu.memory_space<vmem>>, vector<16x128xf32>
    tpu.vector_store %arg5[%c0_6, %c0_7], %17 {strides = array<i32>} : memref<16x128xf32, #tpu.memory_space<vmem>>, vector<16x128xf32>,
    %c0_i32_8 = arith.constant 0 : i32
    %19 = arith.cmpi eq, %arg1, %c0_i32_8 : i32
    %20 = arith.extui %19 : i1 to i32
    %c0_i32_9 = arith.constant 0 : i32
    %21 = arith.cmpi ne, %20, %c0_i32_9 : i32
    scf.if %21 {
      %c0_10 = arith.constant 0 : index
      %c0_11 = arith.constant 0 : index
      %22 = vector.load %arg5[%c0_10, %c0_11] : memref<16x128xf32, #tpu.memory_space<vmem>>, vector<16x128xf32>
      %23 = vector.shape_cast %22 : vector<16x128xf32> to vector<1x16x128xf32>
      %cst_12 = arith.constant dense<0.000000e+00> : vector<1xf32>
      %24 = vector.multi_reduction <add>, %23, %cst_12 [1, 2] : vector<1x16x128xf32> to vector<1xf32>
      %25 = vector.shape_cast %24 : vector<1xf32> to vector<1x1x1xf32>
      %26 = vector.extract %25[0, 0, 0] : f32 from vector<1x1x1xf32>
      %27 = vector.broadcast %26 : f32 to vector<1x8x128xf32>
      %c0_13 = arith.constant 0 : index
      %c0_14 = arith.constant 0 : index
      %c0_15 = arith.constant 0 : index
      %28 = vector.load %arg4[%c0_13, %c0_14, %c0_15] : memref<1x8x128xf32, #tpu.memory_space<vmem>>, vector<1x8x128xf32>
      tpu.vector_store %arg4[%c0_13, %c0_14, %c0_15], %27 {strides = array<i32>} : memref<1x8x128xf32, #tpu.memory_space<vmem>>, vector<1x8x128xf32>,
    } else {
    }
    return
  }
  func.func @transform_0(%arg0: i32, %arg1: i32, %arg2: memref<1xf32, #tpu.memory_space<smem>>) -> (i32, i32) {
    %c1_i32 = arith.constant 1 : i32
    %0 = arith.muli %arg0, %c1_i32 : i32
    %1 = arith.addi %0, %arg1 : i32
    %c0_i32 = arith.constant 0 : i32
    %c0_i32_0 = arith.constant 0 : i32
    return %1, %c0_i32 : i32, i32
  }
  func.func @transform_1(%arg0: i32, %arg1: i32, %arg2: memref<1xf32, #tpu.memory_space<smem>>) -> (i32, i32, i32) {
    %c0_i32 = arith.constant 0 : i32
    %c0_i32_0 = arith.constant 0 : i32
    %c0_i32_1 = arith.constant 0 : i32
    return %arg0, %c0_i32, %c0_i32_0 : i32, i32, i32
  }
}

</mosaic_0001>

<bundles_post_ra>
// kernel: tpu_custom_call.1
= control target key start
LH: loop header
LB: loop body
LE: loop exit
PB: predicated region body
PF: predicated region fallthrough
CT: control target
= control target key end

     0   :  { %8 = vsyncpa [#allocation6], 0  ;;  %s221_s0 = inlined_call_operand.<no memory space> [shape: f32[1], index: 0, kind: input, shape index: {}]   ;;  %s222_s1 = inlined_call_operand.hbm [shape: f32[16,128], index: 1, kind: input, shape index: {}]   ;;  %s223_s2 = inlined_call_operand.hbm [shape: f32[1,8,128], index: 2, kind: output, shape index: {}]  }
   0x1   :  { %9 = vsyncpa [#allocation7], 0  ;;  %s175_s9 = smov [#allocation5]   ;;  %s127_s13 = scalar_lea.hbm %s222_s1, 256 }
   0x2   :  { %s19_s10 = sshll.u32 %s175_s9, 4  ;;  %p128_p0 = scmp.ne.s32.totalorder %s222_s1, %s127_s13  ;;  %s20_s10 = int_to_ptr.vmem [resolvable:$true] %s19_s10 }
   0x3   :  { %p131_p1 = scmp.lt.u32.totalorder %s127_s13, %s222_s1 }
   0x5   :  { %p133_p2 = pnand %p131_p1, %p128_p0 }
   0x7   :  { %136 = shalt.err (!%p133_p2)
}
   0x8   :  { %s137_s18 = scalar_lea.vmem %s20_s10, 256  ;;  %p142_p4 = scmp.lt.s32.totalorder %s20_s10, %s20_s10 }
   0x9   :  { %p138_p3 = scmp.ne.s32.totalorder %s20_s10, %s137_s18  ;;  %p143_p5 = scmp.lt.s32.totalorder %s137_s18, %s137_s18 }
   0xb   :  { %p144_p6 = por %p143_p5, %p142_p4 }
   0xd   :  { %p145_p7 = pnand %p144_p6, %p138_p3 }
   0xf   :  { %148 = shalt.err (!%p145_p7)
}
  0x10   :  { %s176_s19 = smov 128   ;;  %s177_s20 = smov 8  }
  0x11   :  { %25 = dma.hbm_to_vmem [thread:$0]  %s222_s1, 256, %s20_s10, [#allocation6], %s176_s19, %s176_s19, %s177_s20  }
  0x12   :  { %171 = dma.done.wait [#allocation6], 256  }
  0x13   :  { %172 = vsyncadd [#allocation6], 4294967040  ;;  %v38_v0 = vld [vmem:[#allocation5] sm:$0xff]  ;;  %v39_v1 = vld [vmem:[#allocation5 + $0x8] sm:$0xff]  ;;  %v42_v14 = vstv %s221_s0  ;;  %s178_s0 = smov [#allocation8]  }
  0x14   :  { %v47_v2 = vand.u32 2147483647, %v38_v0  ;;  %v48_v3 = vand.u32 2147483647, %v39_v1  ;;  %v40_v16 = vmax.f32 %v38_v0, 0.0  ;;  %v43_v17 = vmul.f32 %v42_v14, %v38_v0  ;;  %s104_s24 = sshll.u32 %s178_s0, 4  ;;  %s105_s24 = int_to_ptr.vmem [resolvable:$true] %s104_s24 }
  0x15   :  { %v41_v20 = vmax.f32 %v39_v1, 0.0  ;;  %v44_v21 = vmul.f32 %v42_v14, %v39_v1  ;;  %s149_s26 = scalar_lea.vmem %s105_s24, 128  ;;  %p154_p9 = scmp.lt.s32.totalorder %s105_s24, %s105_s24 }
  0x16   :  { %v49_v4 = vsub.f32 0.0, %v47_v2  ;;  %v50_v5 = vsub.f32 0.0, %v48_v3  ;;  %v45_v25 = vsub.f32 %v40_v16, %v43_v17  ;;  %p150_p8 = scmp.ne.s32.totalorder %s105_s24, %s149_s26  ;;  %p155_p10 = scmp.lt.s32.totalorder %s149_s26, %s149_s26 }
  0x17   :  { %v46_v28 = vsub.f32 %v41_v20, %v44_v21 }
  0x18   :  { %v51_v6 = vmul.f32 1.442695, %v49_v4  ;;  %v53_v7 = vmul.f32 1.442695, %v50_v5  ;;  %p156_p11 = por %p155_p10, %p154_p9 }
  0x1a   :  { %119 = vpow2.f32 %v51_v6  ;;  %p157_p12 = pnand %p156_p11, %p150_p8 }
  0x1b   :  { %121 = vpow2.f32 %v53_v7 }
  0x24   :  { %v120_v8 = vpop.eup %119 }
  0x25   :  { %v122_v9 = vpop.eup %121  ;;  %v55_v10 = vadd.f32 1.0, %v120_v8  ;;  %v58_v12 = vmul.f32 -0.5, %v120_v8  ;;  %v61_v18 = vand.u32 2147483647, %v120_v8 }
  0x26   :  { %v64_v11 = vadd.f32 1.0, %v122_v9  ;;  %v67_v13 = vmul.f32 -0.5, %v122_v9  ;;  %v70_v22 = vand.u32 2147483647, %v122_v9 }
  0x27   :  { %123 = vlog2.f32 %v55_v10  ;;  %v59_v15 = vadd.f32 1.0, %v58_v12  ;;  %vm62_vm0 = vcmp.lt.f32.partialorder %v61_v18, 0.0004427343 }
  0x28   :  { %125 = vlog2.f32 %v64_v11  ;;  %v68_v19 = vadd.f32 1.0, %v67_v13  ;;  %vm71_vm1 = vcmp.lt.f32.partialorder %v70_v22, 0.0004427343 }
  0x29   :  { %v60_v23 = vmul.f32 %v120_v8, %v59_v15 }
  0x2a   :  { %v69_v26 = vmul.f32 %v122_v9, %v68_v19 }
  0x31   :  { %v124_v24 = vpop.eup %123 }
  0x32   :  { %v126_v27 = vpop.eup %125  ;;  %v57_v29 = vmul.f32 0.6931472, %v124_v24 }
  0x33   :  { %v66_v30 = vmul.f32 0.6931472, %v126_v27 }
  0x34   :  { %v63_v31 = vsel %vm62_vm0, %v60_v23, %v57_v29 }
  0x35   :  { %v72_v32 = vsel %vm71_vm1, %v69_v26, %v66_v30  ;;  %v73_v33 = vadd.f32 %v63_v31, %v45_v25 }
  0x36   :  { %v74_v34 = vadd.f32 %v72_v32, %v46_v28 }
  0x38   :  { %v86_v35 = vadd.f32 %v74_v34, %v73_v33 }
  0x3a   :  { %87 = vadd.xlane.f32.xlu0 %v86_v35 }
  0xc7   :  { %v88_v36 = vpop.xlane.xlu0 %87 }
  0xc8   :  { %v89_v37 = vrot.slane %v88_v36, 4 }
  0xca   :  { %v90_v38 = vadd.f32 %v89_v37, %v88_v36 }
  0xcc   :  { %v91_v39 = vrot.slane %v90_v38, 2 }
  0xce   :  { %v92_v40 = vadd.f32 %v91_v39, %v90_v38 }
  0xd0   :  { %v93_v41 = vrot.slane %v92_v40, 1 }
  0xd2   :  { %v94_v42 = vadd.f32 %v93_v41, %v92_v40 }
  0xd4   :  { %113 = vpush %v94_v42 }
 0x105   :  { %s114_s25 = spop %113 }
 0x106   :  { %v96_v43 = vstv %s114_s25 }
 0x107   :  { %97 = vst [vmem:[#allocation8] sm:$0xff] %v96_v43 }
 0x108   :  { %160 = shalt.err (!%p157_p12)
}
 0x109   :  { %s161_s29 = scalar_lea.hbm %s223_s2, 128 }
 0x10a   :  { %p162_p13 = scmp.ne.s32.totalorder %s223_s2, %s161_s29  ;;  %p165_p0 = scmp.lt.u32.totalorder %s161_s29, %s223_s2 }
 0x10c   :  { %p167_p1 = pnand %p165_p0, %p162_p13 }
 0x10e   :  { %170 = shalt.err (!%p167_p1)
}
 0x10f   :  { %107 = dma.vmem_to_hbm [thread:$0]  %s105_s24, 128, %s223_s2, [#allocation7]  }
 0x110   :  { %173 = dma.done.wait [#allocation7], 128  }
 0x111   :  { %174 = vsyncadd [#allocation7], 4294967168 }
 0x112   :  { %111 = vsyncpa [#allocation6], 1 }
 0x113   :  { %112 = vsyncpa [#allocation7], 1 }

</bundles_post_ra>
